<compile_context>
chip_gen: v6e
topology: v6e:2x2x1
jax: 0.10.0
libtpu: 0.0.40
codegen_flags: <defaults>
</compile_context>

<pallas_src>
import functools

import jax
import jax.numpy as jnp
import numpy as np
from jax.experimental import pallas as pl
from jax.experimental.pallas import tpu as pltpu


def _make_kernel(kernel_size: int, padding: int, bt: int, length: int):
    """Kernel closure over static hyper-params (stride=1, dilation=1, groups=1)."""
    K = kernel_size
    half = bt * length // 2          # pooled rows per grid step

    def kernel(x_ref, s1_ref, b1_ref, w1_ref, b2_ref, w2_ref, o_ref, yscr_ref):
        R, Cp = x_ref.shape          # R = bt * length (flattened batch*length rows)

        def hardswish(v):
            # nn.Hardswish: v * relu6(v + 3) / 6
            return v * jnp.clip(v + 3.0, 0.0, 6.0) * (1.0 / 6.0)

        def conv1d(h2, w_ref):
            # h2: (R, Cp) f32 activations. Cast to bf16 FIRST so padding / tap
            # slicing / concatenation (the im2col slab) move half the bytes; the
            # MXU consumes bf16 with f32 accumulation anyway.
            h3 = h2.astype(jnp.bfloat16).reshape(bt, length, Cp)
            if padding:
                z = jnp.zeros((bt, padding, Cp), jnp.bfloat16)
                h3 = jnp.concatenate([z, h3, z], axis=1)          # (bt, L+2p, Cp)
            taps = [h3[:, k:k + length, :] for k in range(K)]
            slab = taps[0] if K == 1 else jnp.concatenate(taps, axis=-1)
            slab = slab.reshape(R, K * Cp)                        # bf16 im2col slab
            # Single matmul per conv: contraction = K*Cp (>= 256 for K >= 2).
            return jnp.dot(slab, w_ref[...], preferred_element_type=jnp.float32)

        x2 = x_ref[...]                                           # (R, Cp) f32

        # BN1 (folded scale/shift) + Hardswish; Dropout = identity in eval mode.
        h = hardswish(x2 * s1_ref[...] + b1_ref[...])
        h = conv1d(h, w1_ref)                                     # BN2 scale folded in w1
        h = hardswish(h + b2_ref[...])                            # BN2 shift + Hardswish
        y = conv1d(h, w2_ref)

        # MaxPool1d(kernel=2, stride=2): pooled[j] = max(v[2j], v[2j+1]).
        # Pairs never straddle a batch element because L is even.
        # Main path: strided sublane reads from a dedicated f32 VMEM scratch.
        yscr_ref[...] = y
        y_pool = jnp.maximum(yscr_ref[pl.ds(0, half, 2), :],
                             yscr_ref[pl.ds(1, half, 2), :])
        # Residual path: strided reads directly from the input block (no VMEM
        # round trip, no shared-scratch write-after-read serialization).
        id_pool = jnp.maximum(x_ref[pl.ds(0, half, 2), :],
                              x_ref[pl.ds(1, half, 2), :])

        o_ref[...] = (y_pool + id_pool).astype(o_ref.dtype)       # bf16 writeback

    return kernel


def _vmem_budgets():
    """(tile_budget_bytes, vmem_limit_bytes) — generation-aware (v7x: 64 MiB/TC)."""
    try:
        cap = int(pltpu.get_tpu_info().vmem_capacity_bytes)
    except Exception:                               # emulator / older jax: assume 128 MiB
        cap = 128 * 1024 * 1024
    if cap <= 64 * 1024 * 1024:                     # v7x-class TensorCore
        return 18 * 1024 * 1024, 40 * 1024 * 1024
    return 28 * 1024 * 1024, 48 * 1024 * 1024       # v5e / v6e (128 MiB)


def _pick_batch_tile(N, L, Cp, K, budget_bytes):
    """Largest divisor of N that fits the VMEM budget, keeps >=~4 grid steps and
    keeps the (8,128) block alignment for the flattened (Bt*L, Cp) blocks."""
    # Per-batch-element bytes inside one grid step (per L*Cp):
    #   double-buffered input block  (f32)        8
    #   double-buffered output block (bf16, L/2)  2
    #   main-path pooling scratch    (f32)        4
    #   live f32 activations (x2 + h)             8
    #   bf16 padded activations                   2
    #   bf16 im2col slab                          2*K
    #   f32 conv accumulator                      4
    per_elem = L * Cp * (28 + 2 * K)
    cap_vmem = max(1, budget_bytes // max(per_elem, 1))
    cap_grid = max(1, N // 4)        # >= ~4 grid steps: pipeline overlap + v7x 2nd TC
    target = max(1, min(N, cap_vmem, cap_grid))
    for bt in range(target, 0, -1):
        if N % bt == 0 and (bt * L) % 16 == 0:      # block + pooled block sublane-aligned
            return bt
    return N                          # full-array block: no alignment constraint (grid=1)


def resnet_1d_block(x_ncl, g1, be1, m1, v1, w1_oik, g2, be2, m2, v2, w2_oik,
                    *, padding, eps=1e-5):
    """x_ncl: (N, C, L) f32 (PyTorch NCL layout). Returns (N, C, L//2) f32."""
    N, C, L = x_ncl.shape
    K = int(w1_oik.shape[-1])
    assert L % 2 == 0, "MaxPool1d(2,2) requires even L"
    assert 2 * padding == K - 1, "kernel assumes 'same' conv (stride=1, dilation=1)"
    Cp = max(128, ((C + 127) // 128) * 128)          # lane-dense channel padding
    half_L = L // 2

    # Fold BatchNorm (eval mode) into per-channel scale/shift; fold BN2's scale
    # into conv1's output channels so only the shift remains in-kernel.
    s1 = g1 * jax.lax.rsqrt(v1 + eps)
    b1 = be1 - m1 * s1
    s2 = g2 * jax.lax.rsqrt(v2 + eps)
    b2 = be2 - m2 * s2
    w1_folded = w1_oik * s2[:, None, None]

    def pad_c(v):                                    # (C,) -> (1, Cp) f32
        return jnp.pad(v, (0, Cp - C)).reshape(1, Cp).astype(jnp.float32)

    def pack_w(w_oik):                               # (Cout, Cin, K) -> (K*Cp, Cp) bf16
        w = jnp.transpose(w_oik, (2, 1, 0))          # (K, Cin, Cout), tap-major rows
        w = jnp.pad(w, ((0, 0), (0, Cp - C), (0, Cp - C)))
        return w.reshape(K * Cp, Cp).astype(jnp.bfloat16)

    # Glue: NCL -> (N*L, Cp). Padded channels stay exactly 0 through BN(0,0),
    # hardswish(0)=0 and the zero-padded weights, so slicing them off is exact.
    x_2d = jnp.pad(jnp.transpose(x_ncl, (0, 2, 1)),
                   ((0, 0), (0, 0), (0, Cp - C))
                   ).astype(jnp.float32).reshape(N * L, Cp)

    tile_budget, vmem_limit = _vmem_budgets()
    Bt = _pick_batch_tile(N, L, Cp, K, tile_budget)
    grid = (N // Bt,)
    R = Bt * L

    out_2d = pl.pallas_call(
        _make_kernel(K, padding, Bt, L),
        out_shape=jax.ShapeDtypeStruct((N * half_L, Cp), jnp.bfloat16),
        grid=grid,
        in_specs=[
            pl.BlockSpec((R, Cp), lambda n: (n, 0)),              # x (flattened rows)
            pl.BlockSpec((1, Cp), lambda n: (0, 0)),              # BN1 scale
            pl.BlockSpec((1, Cp), lambda n: (0, 0)),              # BN1 shift
            pl.BlockSpec((K * Cp, Cp), lambda n: (0, 0)),         # conv1 W (BN2-scaled)
            pl.BlockSpec((1, Cp), lambda n: (0, 0)),              # BN2 shift
            pl.BlockSpec((K * Cp, Cp), lambda n: (0, 0)),         # conv2 W
        ],
        out_specs=pl.BlockSpec((Bt * half_L, Cp), lambda n: (n, 0)),
        scratch_shapes=[pltpu.VMEM((R, Cp), jnp.float32)],        # main-path pool scratch
        compiler_params=pltpu.CompilerParams(
            dimension_semantics=("parallel",),
            vmem_limit_bytes=vmem_limit),
    )(x_2d, pad_c(s1), pad_c(b1), pack_w(w1_folded), pad_c(b2), pack_w(w2_oik))

    out = out_2d.reshape(N, half_L, Cp)[:, :, :C]
    return jnp.transpose(out, (0, 2, 1)).astype(jnp.float32)      # NLC -> NCL, f32


def _reference(x, g1, be1, m1, v1, w1_oik, g2, be2, m2, v2, w2_oik, padding, eps):
    # Pure-JAX f32 reference mirroring the PyTorch forward (eval mode).
    def bn(v, g, b, m, var):
        return (v - m[None, :, None]) * (g / jnp.sqrt(var + eps))[None, :, None] \
            + b[None, :, None]

    def hsw(v):
        return v * jnp.clip(v + 3.0, 0.0, 6.0) / 6.0

    def conv(v, w):
        return jax.lax.conv_general_dilated(
            v, w, window_strides=(1,), padding=[(padding, padding)],
            dimension_numbers=("NCH", "OIH", "NCH"))

    def maxpool(v):
        return jax.lax.reduce_window(v, -jnp.inf, jax.lax.max,
                                     (1, 1, 2), (1, 1, 2), "VALID")

    out = hsw(bn(x, g1, be1, m1, v1))
    out = conv(out, w1_oik)
    out = hsw(bn(out, g2, be2, m2, v2))
    out = conv(out, w2_oik)
    return maxpool(out) + maxpool(x)


if __name__ == "__main__":
    # Small shapes consistent with the module: in_channels == out_channels so the
    # residual add is valid, stride=1, kernel_size=3, padding=1, downsampling =
    # MaxPool1d(2, 2), dropout=0 (eval mode).
    N, C, L = 2, 8, 16
    K, PAD = 3, 1
    eps = 1e-5

    key = jax.random.PRNGKey(0)
    ks = jax.random.split(key, 11)
    x = jax.random.normal(ks[0], (N, C, L), jnp.float32)

    # Deterministic synthetic parameters (eval-mode BatchNorm running stats).
    g1 = jax.random.uniform(ks[1], (C,), jnp.float32, 0.5, 1.5)
    be1 = 0.1 * jax.random.normal(ks[2], (C,), jnp.float32)
    m1 = 0.1 * jax.random.normal(ks[3], (C,), jnp.float32)
    v1 = jax.random.uniform(ks[4], (C,), jnp.float32, 0.5, 1.5)
    g2 = jax.random.uniform(ks[5], (C,), jnp.float32, 0.5, 1.5)
    be2 = 0.1 * jax.random.normal(ks[6], (C,), jnp.float32)
    m2 = 0.1 * jax.random.normal(ks[7], (C,), jnp.float32)
    v2 = jax.random.uniform(ks[8], (C,), jnp.float32, 0.5, 1.5)
    w1 = jax.random.normal(ks[9], (C, C, K), jnp.float32) / np.sqrt(C * K)
    w2 = jax.random.normal(ks[10], (C, C, K), jnp.float32) / np.sqrt(C * K)

    fn = jax.jit(functools.partial(resnet_1d_block, padding=PAD))
    out = jax.block_until_ready(fn(x, g1, be1, m1, v1, w1, g2, be2, m2, v2, w2))

    ref = _reference(x, g1, be1, m1, v1, w1, g2, be2, m2, v2, w2, PAD, eps)
    # MXU operands are bf16 (f32 accumulation) and writeback is bf16, while the
    # reference is pure f32 — allow ~1% headroom for the cascaded roundings.
    np.testing.assert_allclose(np.asarray(out), np.asarray(ref),
                               rtol=5e-2, atol=5e-2)
    assert out.shape == (N, C, L // 2)
    print("KERNEL_OK")
</pallas_src>

<mosaic_0001>
module attributes {stable_mosaic.version = 11 : i64} {
  func.func @kernel(%arg0: i32, %arg1: memref<16x128xf32, #tpu.memory_space<vmem>>, %arg2: memref<1x128xf32, #tpu.memory_space<vmem>>, %arg3: memref<1x128xf32, #tpu.memory_space<vmem>>, %arg4: memref<384x128xbf16, #tpu.memory_space<vmem>>, %arg5: memref<1x128xf32, #tpu.memory_space<vmem>>, %arg6: memref<384x128xbf16, #tpu.memory_space<vmem>>, %arg7: memref<8x128xbf16, #tpu.memory_space<vmem>>, %arg8: memref<16x128xf32, #tpu.memory_space<vmem>>) attributes {dimension_semantics = [#tpu.dimension_semantics<parallel>], iteration_bounds = array<i64: 2>, scalar_prefetch = 0 : i64, scratch_operands = 1 : i64, tpu.core_type = #tpu.core_type<tc>, window_params = [{transform_indices = @transform_0, window_bounds = array<i64: 16, 128>}, {pipeline_mode = #tpu.pipeline_mode<synchronous>, transform_indices = @transform_1, window_bounds = array<i64: 1, 128>}, {pipeline_mode = #tpu.pipeline_mode<synchronous>, transform_indices = @transform_2, window_bounds = array<i64: 1, 128>}, {pipeline_mode = #tpu.pipeline_mode<synchronous>, transform_indices = @transform_3, window_bounds = array<i64: 384, 128>}, {pipeline_mode = #tpu.pipeline_mode<synchronous>, transform_indices = @transform_4, window_bounds = array<i64: 1, 128>}, {pipeline_mode = #tpu.pipeline_mode<synchronous>, transform_indices = @transform_5, window_bounds = array<i64: 384, 128>}, {transform_indices = @transform_6, window_bounds = array<i64: 8, 128>}]} {
    %c0 = arith.constant 0 : index
    %c0_0 = arith.constant 0 : index
    %0 = vector.load %arg1[%c0, %c0_0] : memref<16x128xf32, #tpu.memory_space<vmem>>, vector<16x128xf32>
    %c0_1 = arith.constant 0 : index
    %c0_2 = arith.constant 0 : index
    %1 = vector.load %arg2[%c0_1, %c0_2] : memref<1x128xf32, #tpu.memory_space<vmem>>, vector<1x128xf32>
    %2 = vector.broadcast %1 : vector<1x128xf32> to vector<16x128xf32>
    %3 = arith.mulf %0, %2 : vector<16x128xf32>
    %c0_3 = arith.constant 0 : index
    %c0_4 = arith.constant 0 : index
    %4 = vector.load %arg3[%c0_3, %c0_4] : memref<1x128xf32, #tpu.memory_space<vmem>>, vector<1x128xf32>
    %5 = vector.broadcast %4 : vector<1x128xf32> to vector<16x128xf32>
    %6 = arith.addf %3, %5 : vector<16x128xf32>
    %cst = arith.constant 3.000000e+00 : f32
    %7 = vector.broadcast %cst : f32 to vector<16x128xf32>
    %8 = arith.addf %6, %7 : vector<16x128xf32>
    %cst_5 = arith.constant 0.000000e+00 : f32
    %cst_6 = arith.constant 6.000000e+00 : f32
    %9 = vector.broadcast %cst_5 : f32 to vector<16x128xf32>
    %10 = arith.maximumf %9, %8 : vector<16x128xf32>
    %11 = vector.broadcast %cst_6 : f32 to vector<16x128xf32>
    %12 = arith.minimumf %11, %10 : vector<16x128xf32>
    %13 = arith.mulf %6, %12 : vector<16x128xf32>
    %cst_7 = arith.constant 0.166666672 : f32
    %14 = vector.broadcast %cst_7 : f32 to vector<16x128xf32>
    %15 = arith.mulf %13, %14 : vector<16x128xf32>
    %16 = arith.truncf %15 : vector<16x128xf32> to vector<16x128xbf16>
    %17 = vector.shape_cast %16 : vector<16x128xbf16> to vector<1x16x128xbf16>
    %cst_8 = arith.constant 0.000000e+00 : bf16
    %18 = vector.broadcast %cst_8 : bf16 to vector<1x1x128xbf16>
    %19 = tpu.concatenate %18, %17, %18 in 1 : vector<1x1x128xbf16>, vector<1x16x128xbf16>, vector<1x1x128xbf16> -> vector<1x18x128xbf16>
    %20 = vector.extract_strided_slice %19 {offsets = [0, 0, 0], sizes = [1, 16, 128], strides = [1, 1, 1]} : vector<1x18x128xbf16> to vector<1x16x128xbf16>
    %21 = vector.extract_strided_slice %19 {offsets = [0, 1, 0], sizes = [1, 16, 128], strides = [1, 1, 1]} : vector<1x18x128xbf16> to vector<1x16x128xbf16>
    %22 = vector.extract_strided_slice %19 {offsets = [0, 2, 0], sizes = [1, 16, 128], strides = [1, 1, 1]} : vector<1x18x128xbf16> to vector<1x16x128xbf16>
    %23 = tpu.concatenate %20, %21, %22 in 2 : vector<1x16x128xbf16>, vector<1x16x128xbf16>, vector<1x16x128xbf16> -> vector<1x16x384xbf16>
    %24 = vector.shape_cast %23 : vector<1x16x384xbf16> to vector<16x384xbf16>
    %c0_9 = arith.constant 0 : index
    %c0_10 = arith.constant 0 : index
    %25 = vector.load %arg4[%c0_9, %c0_10] : memref<384x128xbf16, #tpu.memory_space<vmem>>, vector<384x128xbf16>
    %cst_11 = arith.constant dense<0.000000e+00> : vector<16x128xf32>
    %26 = tpu.matmul %24, %25, %cst_11 {dimension_numbers = #tpu.dot_dimension_numbers<[1], [0], [0], [1], [0, 0, 1, 1], [], []>} : vector<16x384xbf16>, vector<384x128xbf16>, vector<16x128xf32> -> vector<16x128xf32>
    %c0_12 = arith.constant 0 : index
    %c0_13 = arith.constant 0 : index
    %27 = vector.load %arg5[%c0_12, %c0_13] : memref<1x128xf32, #tpu.memory_space<vmem>>, vector<1x128xf32>
    %28 = vector.broadcast %27 : vector<1x128xf32> to vector<16x128xf32>
    %29 = arith.addf %26, %28 : vector<16x128xf32>
    %cst_14 = arith.constant 3.000000e+00 : f32
    %30 = vector.broadcast %cst_14 : f32 to vector<16x128xf32>
    %31 = arith.addf %29, %30 : vector<16x128xf32>
    %cst_15 = arith.constant 0.000000e+00 : f32
    %cst_16 = arith.constant 6.000000e+00 : f32
    %32 = vector.broadcast %cst_15 : f32 to vector<16x128xf32>
    %33 = arith.maximumf %32, %31 : vector<16x128xf32>
    %34 = vector.broadcast %cst_16 : f32 to vector<16x128xf32>
    %35 = arith.minimumf %34, %33 : vector<16x128xf32>
    %36 = arith.mulf %29, %35 : vector<16x128xf32>
    %cst_17 = arith.constant 0.166666672 : f32
    %37 = vector.broadcast %cst_17 : f32 to vector<16x128xf32>
    %38 = arith.mulf %36, %37 : vector<16x128xf32>
    %39 = arith.truncf %38 : vector<16x128xf32> to vector<16x128xbf16>
    %40 = vector.shape_cast %39 : vector<16x128xbf16> to vector<1x16x128xbf16>
    %cst_18 = arith.constant 0.000000e+00 : bf16
    %41 = vector.broadcast %cst_18 : bf16 to vector<1x1x128xbf16>
    %42 = tpu.concatenate %41, %40, %41 in 1 : vector<1x1x128xbf16>, vector<1x16x128xbf16>, vector<1x1x128xbf16> -> vector<1x18x128xbf16>
    %43 = vector.extract_strided_slice %42 {offsets = [0, 0, 0], sizes = [1, 16, 128], strides = [1, 1, 1]} : vector<1x18x128xbf16> to vector<1x16x128xbf16>
    %44 = vector.extract_strided_slice %42 {offsets = [0, 1, 0], sizes = [1, 16, 128], strides = [1, 1, 1]} : vector<1x18x128xbf16> to vector<1x16x128xbf16>
    %45 = vector.extract_strided_slice %42 {offsets = [0, 2, 0], sizes = [1, 16, 128], strides = [1, 1, 1]} : vector<1x18x128xbf16> to vector<1x16x128xbf16>
    %46 = tpu.concatenate %43, %44, %45 in 2 : vector<1x16x128xbf16>, vector<1x16x128xbf16>, vector<1x16x128xbf16> -> vector<1x16x384xbf16>
    %47 = vector.shape_cast %46 : vector<1x16x384xbf16> to vector<16x384xbf16>
    %c0_19 = arith.constant 0 : index
    %c0_20 = arith.constant 0 : index
    %48 = vector.load %arg6[%c0_19, %c0_20] : memref<384x128xbf16, #tpu.memory_space<vmem>>, vector<384x128xbf16>
    %cst_21 = arith.constant dense<0.000000e+00> : vector<16x128xf32>
    %49 = tpu.matmul %47, %48, %cst_21 {dimension_numbers = #tpu.dot_dimension_numbers<[1], [0], [0], [1], [0, 0, 1, 1], [], []>} : vector<16x384xbf16>, vector<384x128xbf16>, vector<16x128xf32> -> vector<16x128xf32>
    %c0_22 = arith.constant 0 : index
    %c0_23 = arith.constant 0 : index
    %50 = vector.load %arg8[%c0_22, %c0_23] : memref<16x128xf32, #tpu.memory_space<vmem>>, vector<16x128xf32>
    tpu.vector_store %arg8[%c0_22, %c0_23], %49 {strides = array<i32>} : memref<16x128xf32, #tpu.memory_space<vmem>>, vector<16x128xf32>,
    %c0_24 = arith.constant 0 : index
    %c0_25 = arith.constant 0 : index
    %51 = tpu.strided_load %arg8[%c0_24, %c0_25] {strides = array<i32: 2, 1>} : memref<16x128xf32, #tpu.memory_space<vmem>>, vector<8x128xf32>
    %c1 = arith.constant 1 : index
    %c0_26 = arith.constant 0 : index
    %52 = tpu.strided_load %arg8[%c1, %c0_26] {strides = array<i32: 2, 1>} : memref<16x128xf32, #tpu.memory_space<vmem>>, vector<8x128xf32>
    %53 = arith.maximumf %51, %52 : vector<8x128xf32>
    %c0_27 = arith.constant 0 : index
    %c0_28 = arith.constant 0 : index
    %54 = tpu.strided_load %arg1[%c0_27, %c0_28] {strides = array<i32: 2, 1>} : memref<16x128xf32, #tpu.memory_space<vmem>>, vector<8x128xf32>
    %c1_29 = arith.constant 1 : index
    %c0_30 = arith.constant 0 : index
    %55 = tpu.strided_load %arg1[%c1_29, %c0_30] {strides = array<i32: 2, 1>} : memref<16x128xf32, #tpu.memory_space<vmem>>, vector<8x128xf32>
    %56 = arith.maximumf %54, %55 : vector<8x128xf32>
    %57 = arith.addf %53, %56 : vector<8x128xf32>
    %58 = arith.truncf %57 : vector<8x128xf32> to vector<8x128xbf16>
    %c0_31 = arith.constant 0 : index
    %c0_32 = arith.constant 0 : index
    %59 = vector.load %arg7[%c0_31, %c0_32] : memref<8x128xbf16, #tpu.memory_space<vmem>>, vector<8x128xbf16>
    tpu.vector_store %arg7[%c0_31, %c0_32], %58 {strides = array<i32>} : memref<8x128xbf16, #tpu.memory_space<vmem>>, vector<8x128xbf16>,
    return
  }
  func.func @transform_0(%arg0: i32) -> (i32, i32) {
    %c0_i32 = arith.constant 0 : i32
    %c0_i32_0 = arith.constant 0 : i32
    return %arg0, %c0_i32 : i32, i32
  }
  func.func @transform_1(%arg0: i32) -> (i32, i32) {
    %c0_i32 = arith.constant 0 : i32
    %c0_i32_0 = arith.constant 0 : i32
    %c0_i32_1 = arith.constant 0 : i32
    return %c0_i32, %c0_i32_0 : i32, i32
  }
  func.func @transform_2(%arg0: i32) -> (i32, i32) {
    %c0_i32 = arith.constant 0 : i32
    %c0_i32_0 = arith.constant 0 : i32
    %c0_i32_1 = arith.constant 0 : i32
    return %c0_i32, %c0_i32_0 : i32, i32
  }
  func.func @transform_3(%arg0: i32) -> (i32, i32) {
    %c0_i32 = arith.constant 0 : i32
    %c0_i32_0 = arith.constant 0 : i32
    %c0_i32_1 = arith.constant 0 : i32
    return %c0_i32, %c0_i32_0 : i32, i32
  }
  func.func @transform_4(%arg0: i32) -> (i32, i32) {
    %c0_i32 = arith.constant 0 : i32
    %c0_i32_0 = arith.constant 0 : i32
    %c0_i32_1 = arith.constant 0 : i32
    return %c0_i32, %c0_i32_0 : i32, i32
  }
  func.func @transform_5(%arg0: i32) -> (i32, i32) {
    %c0_i32 = arith.constant 0 : i32
    %c0_i32_0 = arith.constant 0 : i32
    %c0_i32_1 = arith.constant 0 : i32
    return %c0_i32, %c0_i32_0 : i32, i32
  }
  func.func @transform_6(%arg0: i32) -> (i32, i32) {
    %c0_i32 = arith.constant 0 : i32
    %c0_i32_0 = arith.constant 0 : i32
    return %arg0, %c0_i32 : i32, i32
  }
}

</mosaic_0001>

<bundles_post_ra>
// kernel: resnet_1d_block.1
= control target key start
LH: loop header
LB: loop body
LE: loop exit
PB: predicated region body
PF: predicated region fallthrough
CT: control target
= control target key end

     0   :  { %s1248_s21 = smov 0   ;;  %s1465_s0 = inlined_call_operand.vmem [shape: f32[32,128], index: 0, kind: input, shape index: {}]   ;;  %s1466_s1 = inlined_call_operand.vmem [shape: f32[1,128], index: 1, kind: input, shape index: {}]   ;;  %s1467_s2 = inlined_call_operand.vmem [shape: f32[1,128], index: 2, kind: input, shape index: {}]   ;;  %s1468_s3 = inlined_call_operand.vmem [shape: bf16[384,128], index: 3, kind: input, shape index: {}]   ;;  %s1469_s4 = inlined_call_operand.vmem [shape: f32[1,128], index: 4, kind: input, shape index: {}]   ;;  %s1470_s5 = inlined_call_operand.vmem [shape: bf16[384,128], index: 5, kind: input, shape index: {}]   ;;  %s1471_s6 = inlined_call_operand.vmem [shape: bf16[16,128], index: 6, kind: output, shape index: {}]  }
   0x1 LB: > { %s1254_s22 = sadd.s32 4294967295, %s1209_s21   ;;  %p985_p0 = scmp.ge.s32.totalorder %s1209_s21, 1  ;;  %s1209_s21 = sphi %s1248_s21, %s16_s21  }
   0x2   : > { %p213_p1 = scmp.lt.s32.totalorder %s1209_s21, 3 }
   0x4   : > { %p214_p2 = pnand %p985_p0, %p213_p1 }
   0x5   : > { %s986_s15 = sshll.u32 (!%p214_p2), %s1254_s22, 1  ;;  %p248_p4 = scmp.lt.s32.totalorder (!%p214_p2), %s1254_s22, 1 }
   0x6   : > { %217 = sbr.rel (%p214_p2) target bundleno = 502 (0x1f6), region = 44  ;;  %p243_p3 = scmp.lt.s32.totalorder (!%p214_p2), %s986_s15, 3 }
   0xb   : > { %v1155_v0 = vld [vmem:[%s1468_s3 + $0x78] sm:$0xff]   ;;  %v1211_v1 = vmov 0.0   ;;  %v1158_v4 = vld [vmem:[%s1468_s3 + $0x70] sm:$0xff]   ;;  %v1161_v7 = vld [vmem:[%s1468_s3 + $0x68] sm:$0xff]   ;;  %vm1212_vm0 = vmmov 0   ;;  %s1475_s15 = smov (!%p243_p3, %s986_s15), 3 }
   0xc   : > { %1105 = vmatprep.subr.bf16.mxu1 %v1211_v1  ;;  %v1156_v2 = vld [vmem:[%s1468_s3 + $0x38] sm:$0xff]   ;;  %1043 = vmatprep.subr.bf16.mxu0 %v1155_v0  ;;  %v1159_v5 = vld [vmem:[%s1468_s3 + $0x30] sm:$0xff]   ;;  %v1162_v8 = vld [vmem:[%s1468_s3 + $0x28] sm:$0xff]   ;;  %s987_s12 = sshll.u32 %s1475_s15, 3  ;;  %vm293_vm1 = vcmask 1040384   ;;  %vm314_vm4 = vcmask 1046528  }
   0xd   : > { %v1157_v3 = vld [vmem:[%s1468_s3 + $0xb8] sm:$0xff]   ;;  %1044 = vmatpush3.bf16.msra.mxu0 %v1156_v2  ;;  %v1160_v6 = vld [vmem:[%s1468_s3 + $0xb0] sm:$0xff]   ;;  %1121 = vmatprep.mubr.msk.bf16.mxu1 %vm1212_vm0, %v1211_v1  ;;  %v1163_v9 = vld [vmem:[%s1468_s3 + $0xa8] sm:$0xff]   ;;  %s1330_s15 = scalar_lea.vmem %s1465_s0, %s987_s12  ;;  %vm294_vm2 = vsmask.f32 256  ;;  %s1477_s22 = smov (!%p248_p4, %s1254_s22), 1 }
   0xe   : > { %1106 = vmatpush3.bf16.msra.mxu1 %v1157_v3  ;;  %1045 = vmatprep.subr.bf16.mxu0 %v1158_v4  ;;  %v1164_v10 = vld [vmem:[%s1468_s3 + $0x60] sm:$0xff]   ;;  %v1167_v13 = vld [vmem:[%s1468_s3 + $0x58] sm:$0xff]   ;;  %v1170_v16 = vld [vmem:[%s1468_s3 + $0x50] sm:$0xff]   ;;  %vm298_vm5 = vsmask.f32 7424  ;;  %s988_s23 = sshll.u32 %s1477_s22, 2 }
   0xf   : > { %1107 = vmatprep.subr.bf16.mxu1 %v1211_v1  ;;  %v1165_v11 = vld [vmem:[%s1468_s3 + $0x20] sm:$0xff]   ;;  %v1168_v14 = vld [vmem:[%s1468_s3 + $0x18] sm:$0xff]   ;;  %v1171_v17 = vld [vmem:[%s1468_s3 + $0x10] sm:$0xff]   ;;  %s251_s26 = scalar_lea.vmem %s1471_s6, %s988_s23 }
  0x10   : > { %v1166_v12 = vld [vmem:[%s1468_s3 + $0xa0] sm:$0xff]   ;;  %v1169_v15 = vld [vmem:[%s1468_s3 + $0x98] sm:$0xff]   ;;  %v1172_v18 = vld [vmem:[%s1468_s3 + $0x90] sm:$0xff]  }
  0x11   : > { %1046 = vmatpush3.bf16.msra.mxu0 %v1159_v5  ;;  %v1173_v19 = vld [vmem:[%s1468_s3 + $0x48] sm:$0xff]   ;;  %v1176_v22 = vld [vmem:[%s1468_s3 + $0x40] sm:$0xff]   ;;  %vm1355_vm3 = vmand %vm293_vm1, %vm294_vm2 }
  0x12   : > { %1108 = vmatpush3.bf16.msra.mxu1 %v1160_v6  ;;  %1047 = vmatprep.subr.bf16.mxu0 %v1161_v7  ;;  %v1174_v20 = vld [vmem:[%s1468_s3 + $0x8] sm:$0xff]   ;;  %v253_v23 = vld [vmem:[%s1330_s15] sm:$0xff]  ;;  %v1179_v61 = vld [vmem:[%s1470_s5 + $0xb8] sm:$0xff]  }
  0x13   : > { %1109 = vmatprep.subr.bf16.mxu1 %v1211_v1  ;;  %v1175_v21 = vld [vmem:[%s1468_s3 + $0x88] sm:$0xff]   ;;  %v989_v25 = vld [vmem:[%s1466_s1] ss:$0 sm:$0xff]  ;;  %v1180_v62 = vld [vmem:[%s1470_s5 + $0x78] sm:$0xff]  }
  0x14   : > { %v254_v24 = vld [vmem:[%s1330_s15 + $0x8] sm:$0xff]  ;;  %v1177_v26 = vld [vmem:[%s1468_s3] sm:$0xff]   ;;  %v262_v27 = vmul.f32 %v989_v25, %v253_v23  ;;  %v1181_v63 = vld [vmem:[%s1470_s5 + $0xb0] sm:$0xff]  }
  0x15   : > { %1048 = vmatpush3.bf16.msra.mxu0 %v1162_v8  ;;  %v263_v28 = vmul.f32 %v989_v25, %v254_v24  ;;  %v990_v29 = vld [vmem:[%s1467_s2] ss:$0 sm:$0xff]  ;;  %v1182_v0 = vld [vmem:[%s1470_s5 + $0x38] sm:$0xff]   ;;  %v1183_v2 = vld [vmem:[%s1470_s5 + $0x70] sm:$0xff]  }
  0x16   : > { %1110 = vmatpush3.bf16.msra.mxu1 %v1163_v9  ;;  %1049 = vmatprep.subr.bf16.mxu0 %v1164_v10  ;;  %v1178_v30 = vld [vmem:[%s1468_s3 + $0x80] sm:$0xff]   ;;  %v271_v31 = vadd.f32 %v990_v29, %v262_v27  ;;  %v1184_v3 = vld [vmem:[%s1470_s5 + $0xa8] sm:$0xff]   ;;  %v1185_v4 = vld [vmem:[%s1470_s5 + $0x30] sm:$0xff]  }
  0x17   : > { %1111 = vmatprep.subr.bf16.mxu1 %v1211_v1  ;;  %v272_v32 = vadd.f32 %v990_v29, %v263_v28  ;;  %v1186_v5 = vld [vmem:[%s1470_s5 + $0x68] sm:$0xff]   ;;  %v1187_v6 = vld [vmem:[%s1470_s5 + $0xa0] sm:$0xff]   ;;  %v1190_v9 = vld [vmem:[%s1470_s5 + $0x98] sm:$0xff]  }
  0x18   : > { %v273_v33 = vadd.f32 3.0, %v271_v31  ;;  %v1188_v7 = vld [vmem:[%s1470_s5 + $0x28] sm:$0xff]   ;;  %v1189_v8 = vld [vmem:[%s1470_s5 + $0x60] sm:$0xff]  }
  0x19   : > { %1050 = vmatpush3.bf16.msra.mxu0 %v1165_v11  ;;  %v274_v34 = vadd.f32 3.0, %v272_v32  ;;  %v1191_v10 = vld [vmem:[%s1470_s5 + $0x20] sm:$0xff]   ;;  %v1192_v11 = vld [vmem:[%s1470_s5 + $0x58] sm:$0xff]  }
  0x1a   : > { %1112 = vmatpush3.bf16.msra.mxu1 %v1166_v12  ;;  %1051 = vmatprep.subr.bf16.mxu0 %v1167_v13  ;;  %v275_v35 = vmax.f32 %v273_v33, 0.0  ;;  %v1193_v12 = vld [vmem:[%s1470_s5 + $0x90] sm:$0xff]   ;;  %v1194_v13 = vld [vmem:[%s1470_s5 + $0x18] sm:$0xff]  }
  0x1b   : > { %1113 = vmatprep.subr.bf16.mxu1 %v1211_v1  ;;  %v276_v36 = vmax.f32 %v274_v34, 0.0 }
  0x1c   : > { %v277_v37 = vmin.f32 %v275_v35, 6.0 }
  0x1d   : > { %1052 = vmatpush3.bf16.msra.mxu0 %v1168_v14  ;;  %v278_v38 = vmin.f32 %v276_v36, 6.0  ;;  %v1195_v14 = vld [vmem:[%s1470_s5 + $0x50] sm:$0xff]  }
  0x1e   : > { %1114 = vmatpush3.bf16.msra.mxu1 %v1169_v15  ;;  %1053 = vmatprep.subr.bf16.mxu0 %v1170_v16  ;;  %v279_v39 = vmul.f32 %v277_v37, %v271_v31  ;;  %v1196_v15 = vld [vmem:[%s1470_s5 + $0x88] sm:$0xff]   ;;  %v1197_v16 = vld [vmem:[%s1470_s5 + $0x10] sm:$0xff]  }
  0x1f   : > { %1115 = vmatprep.subr.bf16.mxu1 %v1211_v1  ;;  %v280_v40 = vmul.f32 %v278_v38, %v272_v32 }
  0x20   : > { %v281_v41 = vmul.f32 0.16666667, %v279_v39 }
  0x21   : > { %1054 = vmatpush3.bf16.msra.mxu0 %v1171_v17  ;;  %v282_v42 = vmul.f32 0.16666667, %v280_v40  ;;  %v1198_v17 = vld [vmem:[%s1470_s5 + $0x48] sm:$0xff]  }
  0x22   : > { %1116 = vmatpush3.bf16.msra.mxu1 %v1172_v18  ;;  %1055 = vmatprep.subr.bf16.mxu0 %v1173_v19  ;;  %v1199_v18 = vld [vmem:[%s1470_s5 + $0x80] sm:$0xff]   ;;  %v1200_v19 = vld [vmem:[%s1470_s5 + $0x8] sm:$0xff]  }
  0x23   : > { %1117 = vmatprep.subr.bf16.mxu1 %v1211_v1  ;;  %v283_v43 = vpack.c.bf16 %v282_v42, %v281_v41 }
  0x25   : > { %1056 = vmatpush3.bf16.msra.mxu0 %v1174_v20  ;;  %v285_v44 = vshrl.u32 %v283_v43, 16  ;;  %v288_v45 = vshll.u32 %v283_v43, 16  ;;  %v1201_v20 = vld [vmem:[%s1470_s5 + $0x40] sm:$0xff]  }
  0x26   : > { %1118 = vmatpush3.bf16.msra.mxu1 %v1175_v21  ;;  %1057 = vmatprep.subr.bf16.mxu0 %v1176_v22  ;;  %v1202_v21 = vld [vmem:[%s1470_s5] sm:$0xff]  }
  0x27   : > { %1119 = vmatprep.subr.bf16.mxu1 %v1211_v1  ;;  %v287_v46 = vrot.slane %v285_v44, 7 }
  0x29   : > { %1058 = vmatpush3.bf16.msra.mxu0 %v1177_v26  ;;  %v290_v48 = vor.u32 %v288_v45, %v287_v46  ;;  %v297_v49 = vsel %vm1355_vm3, %v287_v46, 0  ;;  %v991_v26 = vld [vmem:[%s1469_s4] ss:$0 sm:$0xff] }
  0x2a   : > { %1120 = vmatpush3.bf16.msra.mxu1 %v1178_v30  ;;  %v307_v50 = vshll.u32 %v297_v49, 16  ;;  %v316_v51 = vrot.slane %v297_v49, 1  ;;  %1074 = vmatprep.subr.bf16.mxu0 %v1180_v62 }
  0x2b   : > { %1125 = vmatprep.subr.bf16.mxu1 %v1211_v1  ;;  %v296_v52 = vsel %vm1355_vm3, 0, %v290_v48 }
  0x2c   : > { %v300_v53 = vshrl.u32 %v296_v52, 16  ;;  %v302_v54 = vshll.u32 %v296_v52, 16  ;;  %v315_v55 = vrot.slane %v296_v52, 1  ;;  %v309_v57 = vrot.slane %v307_v50, 1 }
  0x2e   : > { %v304_v56 = vrot.slane %v302_v54, 1  ;;  %v317_v58 = vsel %vm314_vm4, %v315_v55, %v316_v51 }
  0x2f   : > { %1122 = vmatmul.mubr.bf16.vlgmr.msra.gmra.mxu1 %v317_v58 }
  0x30   : > { %v305_v59 = vor.u32 %v304_v56, %v300_v53  ;;  %1141 = vmatprep.mubr.msk.bf16.mxu1 %vm1212_vm0, %v1211_v1  ;;  %1126 = vmatpush3.bf16.msra.mxu1 %v1179_v61 }
  0x31   : > { %1127 = vmatprep.subr.bf16.mxu1 %v1211_v1 }
  0x32   : > { %v310_v60 = vsel %vm298_vm5, %v305_v59, %v309_v57 }
  0x33   : > { %550 = vmatprep.mubr.bf16.mxu0 %v310_v60 }
  0x34   : > { %551 = vmatmul.mubr.bf16.vlgmr.msra.gmra.mxu0 %v296_v52  ;;  %1128 = vmatpush3.bf16.msra.mxu1 %v1181_v63 }
  0x35   : > { %1075 = vmatpush3.bf16.msra.mxu0 %v1182_v0  ;;  %1129 = vmatprep.subr.bf16.mxu1 %v1211_v1 }
  0x36   : > { %1076 = vmatprep.subr.bf16.mxu0 %v1183_v2 }
  0x38   : > { %1130 = vmatpush3.bf16.msra.mxu1 %v1184_v3 }
  0x39   : > { %1077 = vmatpush3.bf16.msra.mxu0 %v1185_v4  ;;  %1131 = vmatprep.subr.bf16.mxu1 %v1211_v1 }
  0x3a   : > { %1078 = vmatprep.subr.bf16.mxu0 %v1186_v5 }
  0x3c   : > { %1132 = vmatpush3.bf16.msra.mxu1 %v1187_v6 }
  0x3d   : > { %1079 = vmatpush3.bf16.msra.mxu0 %v1188_v7  ;;  %1133 = vmatprep.subr.bf16.mxu1 %v1211_v1 }
  0x3e   : > { %1080 = vmatprep.subr.bf16.mxu0 %v1189_v8 }
  0x40   : > { %1134 = vmatpush3.bf16.msra.mxu1 %v1190_v9 }
  0x41   : > { %1081 = vmatpush3.bf16.msra.mxu0 %v1191_v10  ;;  %1135 = vmatprep.subr.bf16.mxu1 %v1211_v1 }
  0x42   : > { %1082 = vmatprep.subr.bf16.mxu0 %v1192_v11 }
  0x44   : > { %1136 = vmatpush3.bf16.msra.mxu1 %v1193_v12  ;;  %v921_v12 = vld [vmem:[%s1330_s15] ss:$2 sm:$0xff] }
  0x45   : > { %1083 = vmatpush3.bf16.msra.mxu0 %v1194_v13  ;;  %1137 = vmatprep.subr.bf16.mxu1 %v1211_v1  ;;  %v1040_v13 = vld [vmem:[%s1330_s15 + $0x1] ss:$2 sm:$0xff] }
  0x46   : > { %1084 = vmatprep.subr.bf16.mxu0 %v1195_v14  ;;  %v924_v14 = vmax.f32 %v921_v12, %v1040_v13 }
  0x48   : > { %1138 = vmatpush3.bf16.msra.mxu1 %v1196_v15 }
  0x49   : > { %1085 = vmatpush3.bf16.msra.mxu0 %v1197_v16  ;;  %1139 = vmatprep.subr.bf16.mxu1 %v1211_v1 }
  0x4a   : > { %1086 = vmatprep.subr.bf16.mxu0 %v1198_v17 }
  0x4c   : > { %1140 = vmatpush3.bf16.msra.mxu1 %v1199_v18 }
  0x4d   : > { %1087 = vmatpush3.bf16.msra.mxu0 %v1200_v19 }
  0x4e   : > { %1088 = vmatprep.subr.bf16.mxu0 %v1201_v20 }
  0x51   : > { %1089 = vmatpush3.bf16.msra.mxu0 %v1202_v21 }
  0xef   : > { %v593_v22 = vpop.f32.mrf.mxu1 }
  0xf1   : > { %v1123_v23 = vpop.f32.mrf.mxu1 }
  0xf3   : > { %v596_v1 = vpop.f32.mrf.mxu1 }
  0xf4   : > { %v1059_v24 = vpop.f32.mrf.mxu0 }
  0xf5   : > { %v1124_v25 = vpop.f32.mrf.mxu1 }
  0xf6   : > { %v1060_v27 = vpop.f32.mrf.mxu0 }
  0xf7   : > { %v1061_v28 = vadd.f32 %v1060_v27, %v1059_v24 }
  0xf8   : > { %v1062_v29 = vpop.f32.mrf.mxu0 }
  0xf9   : > { %v553_v30 = vadd.f32 %v1061_v28, %v991_v26 }
  0xfa   : > { %v1063_v31 = vpop.f32.mrf.mxu0 }
  0xfb   : > { %v594_v32 = vadd.f32 %v593_v22, %v553_v30  ;;  %v1064_v33 = vadd.f32 %v1063_v31, %v1062_v29 }
  0xfd   : > { %v600_v34 = vadd.f32 3.0, %v594_v32  ;;  %v556_v35 = vadd.f32 %v1064_v33, %v991_v26 }
  0xff   : > { %v602_v36 = vmax.f32 %v600_v34, 0.0  ;;  %v597_v37 = vadd.f32 %v596_v1, %v556_v35 }
 0x101   : > { %v604_v38 = vmin.f32 %v602_v36, 6.0  ;;  %v601_v39 = vadd.f32 3.0, %v597_v37 }
 0x103   : > { %v603_v40 = vmax.f32 %v601_v39, 0.0  ;;  %v606_v41 = vmul.f32 %v604_v38, %v594_v32 }
 0x105   : > { %v605_v42 = vmin.f32 %v603_v40, 6.0  ;;  %v608_v44 = vmul.f32 0.16666667, %v606_v41 }
 0x107   : > { %v607_v43 = vmul.f32 %v605_v42, %v597_v37 }
 0x109   : > { %v609_v45 = vmul.f32 0.16666667, %v607_v43 }
 0x10b   : > { %v610_v46 = vpack.c.bf16 %v609_v45, %v608_v44 }
 0x10d   : > { %v612_v48 = vshrl.u32 %v610_v46, 16  ;;  %v615_v49 = vshll.u32 %v610_v46, 16 }
 0x10f   : > { %v614_v50 = vrot.slane %v612_v48, 7 }
 0x111   : > { %v617_v51 = vor.u32 %v615_v49, %v614_v50  ;;  %v621_v52 = vsel %vm1355_vm3, %v614_v50, 0 }
 0x112   : > { %v638_v55 = vrot.slane %v621_v52, 1  ;;  %v630_v57 = vshll.u32 %v621_v52, 16 }
 0x113   : > { %v620_v53 = vsel %vm1355_vm3, 0, %v617_v51 }
 0x114   : > { %v637_v54 = vrot.slane %v620_v53, 1  ;;  %v625_v56 = vshll.u32 %v620_v53, 16  ;;  %v623_v59 = vshrl.u32 %v620_v53, 16  ;;  %v632_v62 = vrot.slane %v630_v57, 1 }
 0x116   : > { %v639_v58 = vsel %vm314_vm4, %v637_v54, %v638_v55  ;;  %v627_v60 = vrot.slane %v625_v56, 1 }
 0x117   : > { %1142 = vmatmul.mubr.bf16.vlgmr.msra.gmra.mxu1 %v639_v58 }
 0x118   : > { %v628_v61 = vor.u32 %v627_v60, %v623_v59 }
 0x11a   : > { %v633_v63 = vsel %vm298_vm5, %v628_v61, %v632_v62 }
 0x11b   : > { %865 = vmatprep.mubr.bf16.mxu0 %v633_v63 }
 0x11c   : > { %866 = vmatmul.mubr.bf16.vlgmr.msra.gmra.mxu0 %v620_v53 }
 0x1d7   : > { %v908_v0 = vpop.f32.mrf.mxu1 }
 0x1d9   : > { %v1143_v47 = vpop.f32.mrf.mxu1 }
 0x1db   : > { %v911_v2 = vpop.f32.mrf.mxu1 }
 0x1dc   : > { %v1090_v3 = vpop.f32.mrf.mxu0 }
 0x1dd   : > { %v1144_v4 = vpop.f32.mrf.mxu1 }
 0x1de   : > { %v1091_v5 = vpop.f32.mrf.mxu0 }
 0x1df   : > { %v1092_v6 = vadd.f32 %v1091_v5, %v1090_v3 }
 0x1e0   : > { %v1093_v7 = vpop.f32.mrf.mxu0 }
 0x1e1   : > { %v909_v8 = vadd.f32 %v1092_v6, %v908_v0 }
 0x1e2   : > { %v1094_v9 = vpop.f32.mrf.mxu0 }
 0x1e3   : > { %915 = vst [vmem:[#allocation2] sm:$0xff] %v909_v8  ;;  %v1095_v10 = vadd.f32 %v1094_v9, %v1093_v7 }
 0x1e5   : > { %v912_v11 = vadd.f32 %v1095_v10, %v911_v2 }
 0x1e7   : > { %916 = vst [vmem:[#allocation2 + $0x8] sm:$0xff] %v912_v11 }
 0x1ee   : > { %v917_v15 = vld [vmem:[#allocation2] ss:$2 sm:$0xff]  ;;  %v919_v16 = vld [vmem:[#allocation2 + $0x1] ss:$2 sm:$0xff] }
 0x1ef   : > { %v920_v17 = vmax.f32 %v917_v15, %v919_v16 }
 0x1f1   : > { %v925_v18 = vadd.f32 %v924_v14, %v920_v17 }
 0x1f3   : > { %v926_v19 = vpack.c.bf16 %v925_v18, %v925_v18 }
 0x1f5   : > { %927 = vst [vmem:[%s251_s26] sm:$0xf] %v926_v19 }
 0x1f6 PF: > { %s16_s21 = sadd.s32 1, %s1209_s21  }
 0x1f7   : > { %p13_p5 = scmp.ge.s32.totalorder %s16_s21, 4  }
 0x1f9   :  { %15 = sbr.rel (!%p13_p5) target bundleno = 1 (0x1), region = 76 }

</bundles_post_ra>
